<compile_context>
chip_gen: v7x
topology: tpu7x:2x2x1
jax: 0.10.0
libtpu: 0.0.40
codegen_flags: <defaults>
</compile_context>

<pallas_src>
import jax
import jax.numpy as jnp
import numpy as np
from jax.experimental import pallas as pl
from jax.experimental.pallas import tpu as pltpu

VOCAB = 64
DIM = 32
CNTX = 8       # == sequence length; learn_pos is Linear(cntx, dim) applied to arange(L)
NLAYERS = 0    # TODO(synk): LearnFormerBlock definition was not provided; blocks are treated as identity.

VP = 128       # vocab padded to a full 128-lane vreg (lane-dense logits stores / full MXU N)
DP = 128       # dim padded to a full 128-lane vreg (lane-dense gathered rows / full MXU K)
NEG = -1e30    # bias for padded vocab columns: exp(NEG - m) underflows to 0 in the LSE


def _infer_kernel(ids_ref, emb_ref, posb_ref, bhead_ref, out_ref, h_scr):
    """Last-token-only inference: out = (emb[x[:, -1]] + pos) @ emb^T + bhead, shape (B, VP)."""
    B, L = ids_ref.shape
    # ids are SMEM scalars; gather one embedding row per sequence (dynamic sublane load).
    for b in range(B):
        h_scr[pl.ds(b, 1), :] = emb_ref[pl.ds(ids_ref[b, L - 1], 1), :]
    h_last = h_scr[...] + posb_ref[...]                                   # (B, DP)
    # h_last @ emb^T via dot_general (contract last dims) -- no in-kernel transpose.
    logits = jax.lax.dot_general(h_last, emb_ref[...],
                                 (((1,), (1,)), ((), ())),
                                 preferred_element_type=jnp.float32)
    out_ref[...] = logits + bhead_ref[...]                                # lane-dense (B, 128) store


def _train_kernel(ids_ref, y_ref, emb_ref, embt_ref, posb_ref, bhead_ref,
                  logits_ref, loss_ref, h_scr, t_scr):
    """Full-sequence logits + mean cross-entropy (F.cross_entropy default reduction)."""
    B, L = ids_ref.shape
    BL = B * L
    # Gather token rows (for hidden states) and label rows (for the target logit).
    # embt carries the lm_head bias in column DIM; posb carries a matching 1.0 there.
    for i in range(BL):
        b, l = divmod(i, L)
        h_scr[pl.ds(i, 1), :] = emb_ref[pl.ds(ids_ref[b, l], 1), :]
        t_scr[pl.ds(i, 1), :] = embt_ref[pl.ds(y_ref[b, l], 1), :]
    h = h_scr[...] + posb_ref[...]                                        # (BL, DP); h[:, DIM] == 1.0
    # (blocks would run here; identity for NLAYERS == 0)
    logits = jax.lax.dot_general(h, emb_ref[...],
                                 (((1,), (1,)), ((), ())),
                                 preferred_element_type=jnp.float32) + bhead_ref[...]
    logits_ref[...] = logits                                              # lane-dense (BL, 128) store
    # numerically stable log-sum-exp over the (padded) vocab lanes
    m = jnp.max(logits, axis=-1, keepdims=True)
    lse = m + jnp.log(jnp.sum(jnp.exp(logits - m), axis=-1, keepdims=True))   # (BL, 1)
    # target logit incl. lm_head bias: sum_d embt[y_i, d] * h[i, d]
    tgt = jnp.sum(t_scr[...] * h, axis=-1, keepdims=True)                     # (BL, 1)
    loss_ref[0, 0] = jnp.sum(lse - tgt) * (1.0 / BL)                          # scalar -> SMEM


def init_params(key):
    k1, k2, k3, k4 = jax.random.split(key, 4)
    return dict(
        emb=jax.random.normal(k1, (VOCAB, DIM), jnp.float32) * 0.02,   # shared embed / lm_head weight
        wpos=jax.random.normal(k2, (DIM, CNTX), jnp.float32) * 0.02,   # learn_pos.weight (dim, cntx)
        bpos=jax.random.normal(k3, (DIM,), jnp.float32) * 0.02,        # learn_pos.bias
        bhead=jax.random.normal(k4, (VOCAB,), jnp.float32) * 0.02,     # lm_head.bias
    )


def _prepare(params):
    """Hoisted, lane-dense parameter preprocessing (pure function of params)."""
    emb = params["emb"].astype(jnp.float32)
    bhead = params["bhead"].astype(jnp.float32)
    # shared weight, zero-padded to (VP, DP)
    emb_pad = jnp.zeros((VP, DP), jnp.float32).at[:VOCAB, :DIM].set(emb)
    # label-gather copy: identical, plus lm_head bias stashed in column DIM
    embt_pad = emb_pad.at[:VOCAB, DIM].set(bhead)
    # learn_pos(arange(L)) collapses to one (D,) vector -> computed once here
    pos = jnp.arange(CNTX, dtype=jnp.float32)
    pos_emb = params["wpos"].astype(jnp.float32) @ pos + params["bpos"].astype(jnp.float32)
    posb_pad = jnp.zeros((1, DP), jnp.float32).at[0, :DIM].set(pos_emb)
    posb_pad = posb_pad.at[0, DIM].set(1.0)    # pairs with the bias column of embt_pad
    # head bias; padded vocab columns get NEG so they drop out of softmax / LSE
    bhead_pad = jnp.full((1, VP), NEG, jnp.float32).at[0, :VOCAB].set(bhead)
    return emb_pad, embt_pad, posb_pad, bhead_pad


def learnformer_forward(params, x, y=None):
    B, L = x.shape
    assert L == CNTX, "learn_pos is Linear(cntx, dim); forward requires seq_len == cntx"
    emb_pad, embt_pad, posb_pad, bhead_pad = _prepare(params)
    x = x.astype(jnp.int32)
    smem = pl.BlockSpec(memory_space=pltpu.MemorySpace.SMEM)
    vmem = pl.BlockSpec(memory_space=pltpu.MemorySpace.VMEM)
    # TODO(synk): if B*L / VOCAB scale up, add a row-tiled grid with
    # dimension_semantics=("parallel",) (two v7x TensorCores), tile the vocab axis with an
    # online LSE to respect v7x's 64 MiB VMEM, and cast matmul operands to bf16 on v6e/v7x.

    if y is None:
        logits = pl.pallas_call(
            _infer_kernel,
            out_shape=jax.ShapeDtypeStruct((B, VP), jnp.float32),
            in_specs=[smem, vmem, vmem, vmem],
            out_specs=vmem,
            scratch_shapes=[pltpu.VMEM((B, DP), jnp.float32)],
        )(x, emb_pad, posb_pad, bhead_pad)
        return logits[:, :VOCAB].reshape(B, 1, VOCAB)

    y = y.astype(jnp.int32)
    logits, loss = pl.pallas_call(
        _train_kernel,
        out_shape=(jax.ShapeDtypeStruct((B * L, VP), jnp.float32),
                   jax.ShapeDtypeStruct((1, 1), jnp.float32)),
        in_specs=[smem, smem, vmem, vmem, vmem, vmem],
        out_specs=(vmem, smem),
        scratch_shapes=[pltpu.VMEM((B * L, DP), jnp.float32),
                        pltpu.VMEM((B * L, DP), jnp.float32)],
    )(x, y, emb_pad, embt_pad, posb_pad, bhead_pad)
    return loss[0, 0], logits[:, :VOCAB].reshape(B, L, VOCAB)


def reference_forward(params, x, y=None):
    pos = jnp.arange(x.shape[1], dtype=jnp.float32)
    pos_emb = params["wpos"] @ pos + params["bpos"]                    # (D,)
    h = params["emb"][x] + pos_emb                                     # (B, L, D)
    if y is None:
        return h[:, -1:, :] @ params["emb"].T + params["bhead"]
    logits = h @ params["emb"].T + params["bhead"]
    logp = jax.nn.log_softmax(logits, axis=-1)
    nll = -jnp.take_along_axis(logp.reshape(-1, VOCAB), y.reshape(-1, 1), axis=-1)
    return jnp.mean(nll), logits


if __name__ == "__main__":
    key = jax.random.PRNGKey(0)
    pkey, xkey, ykey = jax.random.split(key, 3)
    params = init_params(pkey)
    B, L = 2, CNTX
    x = jax.random.randint(xkey, (B, L), 0, VOCAB, dtype=jnp.int32)
    y = jax.random.randint(ykey, (B, L), 0, VOCAB, dtype=jnp.int32)

    # inference branch: logits for the last position only, shape (B, 1, V)
    logits_inf = jax.block_until_ready(learnformer_forward(params, x))
    ref_inf = reference_forward(params, x)
    np.testing.assert_allclose(np.asarray(logits_inf), np.asarray(ref_inf),
                               rtol=1e-4, atol=1e-4)

    # training branch: (loss, logits)
    loss, logits_all = learnformer_forward(params, x, y)
    loss = jax.block_until_ready(loss)
    ref_loss, ref_logits = reference_forward(params, x, y)
    np.testing.assert_allclose(np.asarray(logits_all), np.asarray(ref_logits),
                               rtol=1e-4, atol=1e-4)
    np.testing.assert_allclose(np.asarray(loss), np.asarray(ref_loss),
                               rtol=1e-4, atol=1e-4)

    print("KERNEL_OK")
</pallas_src>

<mosaic_0001>
module attributes {stable_mosaic.version = 11 : i64} {
  func.func @_infer_kernel(%arg0: memref<2x8xi32, #tpu.memory_space<smem>>, %arg1: memref<128x128xf32, #tpu.memory_space<vmem>>, %arg2: memref<1x128xf32, #tpu.memory_space<vmem>>, %arg3: memref<1x128xf32, #tpu.memory_space<vmem>>, %arg4: memref<2x128xf32, #tpu.memory_space<vmem>>, %arg5: memref<2x128xf32, #tpu.memory_space<vmem>>) attributes {dimension_semantics = [], scalar_prefetch = 0 : i64, scratch_operands = 1 : i64, tpu.core_type = #tpu.core_type<tc>} {
    %c0 = arith.constant 0 : index
    %c7 = arith.constant 7 : index
    %0 = memref.load %arg0[%c0, %c7] : memref<2x8xi32, #tpu.memory_space<smem>>
    %1 = arith.index_cast %0 : i32 to index
    %c0_0 = arith.constant 0 : index
    %2 = vector.load %arg1[%1, %c0_0] : memref<128x128xf32, #tpu.memory_space<vmem>>, vector<1x128xf32>
    %c0_1 = arith.constant 0 : index
    %c0_2 = arith.constant 0 : index
    %3 = vector.load %arg5[%c0_1, %c0_2] : memref<2x128xf32, #tpu.memory_space<vmem>>, vector<1x128xf32>
    tpu.vector_store %arg5[%c0_1, %c0_2], %2 {strides = array<i32>} : memref<2x128xf32, #tpu.memory_space<vmem>>, vector<1x128xf32>,
    %c1 = arith.constant 1 : index
    %c7_3 = arith.constant 7 : index
    %4 = memref.load %arg0[%c1, %c7_3] : memref<2x8xi32, #tpu.memory_space<smem>>
    %5 = arith.index_cast %4 : i32 to index
    %c0_4 = arith.constant 0 : index
    %6 = vector.load %arg1[%5, %c0_4] : memref<128x128xf32, #tpu.memory_space<vmem>>, vector<1x128xf32>
    %c1_5 = arith.constant 1 : index
    %c0_6 = arith.constant 0 : index
    %7 = vector.load %arg5[%c1_5, %c0_6] : memref<2x128xf32, #tpu.memory_space<vmem>>, vector<1x128xf32>
    tpu.vector_store %arg5[%c1_5, %c0_6], %6 {strides = array<i32>} : memref<2x128xf32, #tpu.memory_space<vmem>>, vector<1x128xf32>,
    %c0_7 = arith.constant 0 : index
    %c0_8 = arith.constant 0 : index
    %8 = vector.load %arg5[%c0_7, %c0_8] : memref<2x128xf32, #tpu.memory_space<vmem>>, vector<2x128xf32>
    %c0_9 = arith.constant 0 : index
    %c0_10 = arith.constant 0 : index
    %9 = vector.load %arg2[%c0_9, %c0_10] : memref<1x128xf32, #tpu.memory_space<vmem>>, vector<1x128xf32>
    %10 = vector.broadcast %9 : vector<1x128xf32> to vector<2x128xf32>
    %11 = arith.addf %8, %10 : vector<2x128xf32>
    %c0_11 = arith.constant 0 : index
    %c0_12 = arith.constant 0 : index
    %12 = vector.load %arg1[%c0_11, %c0_12] : memref<128x128xf32, #tpu.memory_space<vmem>>, vector<128x128xf32>
    %cst = arith.constant dense<0.000000e+00> : vector<2x128xf32>
    %13 = tpu.matmul %11, %12, %cst {dimension_numbers = #tpu.dot_dimension_numbers<[1], [1], [0], [0], [0, 0, 1, 0], [], []>} : vector<2x128xf32>, vector<128x128xf32>, vector<2x128xf32> -> vector<2x128xf32>
    %c0_13 = arith.constant 0 : index
    %c0_14 = arith.constant 0 : index
    %14 = vector.load %arg3[%c0_13, %c0_14] : memref<1x128xf32, #tpu.memory_space<vmem>>, vector<1x128xf32>
    %15 = vector.broadcast %14 : vector<1x128xf32> to vector<2x128xf32>
    %16 = arith.addf %13, %15 : vector<2x128xf32>
    %c0_15 = arith.constant 0 : index
    %c0_16 = arith.constant 0 : index
    %17 = vector.load %arg4[%c0_15, %c0_16] : memref<2x128xf32, #tpu.memory_space<vmem>>, vector<2x128xf32>
    tpu.vector_store %arg4[%c0_15, %c0_16], %16 {strides = array<i32>} : memref<2x128xf32, #tpu.memory_space<vmem>>, vector<2x128xf32>,
    return
  }
}

</mosaic_0001>

<bundles_post_ra>
// kernel: tpu_custom_call.1
= control target key start
LH: loop header
LB: loop body
LE: loop exit
PB: predicated region body
PF: predicated region fallthrough
CT: control target
= control target key end

     0   :  { %9 = vsyncpa [#allocation6], 0  ;;  %s395_s0 = inlined_call_operand.hbm [shape: s32[2,8], index: 0, kind: input, shape index: {}]   ;;  %s396_s1 = inlined_call_operand.hbm [shape: f32[128,128], index: 1, kind: input, shape index: {}]   ;;  %s397_s2 = inlined_call_operand.vmem [shape: f32[1,128], index: 2, kind: input, shape index: {}]   ;;  %s398_s3 = inlined_call_operand.vmem [shape: f32[1,128], index: 3, kind: input, shape index: {}]   ;;  %s399_s4 = inlined_call_operand.hbm [shape: f32[2,128], index: 4, kind: output, shape index: {}]  }
   0x1   :  { %10 = vsyncpa [#allocation4], 0 }
   0x2   :  { %11 = vsyncpa [#allocation5], 0  ;;  %s260_s17 = scalar_lea.hbm %s395_s0, 32 }
   0x3   :  { %p261_p0 = scmp.ne.s32.totalorder %s395_s0, %s260_s17  ;;  %p264_p1 = scmp.lt.u32.totalorder %s260_s17, %s395_s0 }
   0x5   :  { %p266_p2 = pnand %p264_p1, %p261_p0 }
   0x7   :  { %269 = shalt.err (!%p266_p2)
}
   0x8   :  { %s320_s22 = smov [#allocation3]   ;;  %s321_s25 = smov [#allocation7]  }
   0x9   :  { %19 = dma.hbm_to_smem %s395_s0, 32, %s320_s22, [#allocation6]  }
   0xa   :  { %s25_s26 = sshll.u32 %s321_s25, 4  ;;  %s270_s29 = scalar_lea.hbm %s396_s1, 2048  ;;  %s26_s26 = int_to_ptr.vmem [resolvable:$true] %s25_s26 }
   0xb   :  { %p271_p3 = scmp.ne.s32.totalorder %s396_s1, %s270_s29  ;;  %p274_p4 = scmp.lt.u32.totalorder %s270_s29, %s396_s1 }
   0xd   :  { %p276_p5 = pnand %p274_p4, %p271_p3 }
   0xf   :  { %279 = shalt.err (!%p276_p5)
}
  0x10   :  { %s280_s8 = scalar_lea.vmem %s26_s26, 2048  ;;  %p285_p7 = scmp.lt.s32.totalorder %s26_s26, %s26_s26 }
  0x11   :  { %p281_p6 = scmp.ne.s32.totalorder %s26_s26, %s280_s8  ;;  %p286_p8 = scmp.lt.s32.totalorder %s280_s8, %s280_s8 }
  0x13   :  { %p287_p9 = por %p286_p8, %p285_p7 }
  0x15   :  { %p288_p10 = pnand %p287_p9, %p281_p6 }
  0x17   :  { %291 = shalt.err (!%p288_p10)
}
  0x18   :  { %s322_s0 = smov 128   ;;  %s323_s9 = smov 8  }
  0x19   :  { %31 = dma.hbm_to_vmem [thread:$0]  %s396_s1, 2048, %s26_s26, [#allocation4], %s322_s0, %s322_s0, %s323_s9  }
  0x1a   :  { %314 = dma.done.wait [#allocation6], 32  }
  0x1b   :  { %315 = vsyncadd [#allocation6], 4294967264 }
  0x1c   :  { %316 = dma.done.wait [#allocation4], 2048  }
  0x1d   :  { %317 = vsyncadd [#allocation4], 4294965248 }
  0x1e   :  { %42 = sfence }
  0x1f   :  { %v60_v0 = vld [vmem:[#allocation7] sm:$0xff]  ;;  %v61_v1 = vld [vmem:[#allocation7 + $0x8] sm:$0xff]  ;;  %v324_v2 = vmov 0.0|0.0   ;;  %vm325_vm0 = vmmov 0   ;;  %v326_v4 = vmov 0.0   ;;  %s172_s12 = sld [smem:[#allocation3 + $0x7]] }
  0x20   :  { %228 = vmatprep.subr.bf16.mxu0 %v324_v2  ;;  %v229_v3 = vpack.c.bf16 %v61_v1, %v60_v0  ;;  %225 = vmatprep.mubr.msk.f32.mxu0 %vm325_vm0, %v326_v4  ;;  %s173_s13 = sld [smem:[#allocation3 + $0x87]]  ;;  %v62_v5 = vld [vmem:[#allocation7 + $0x10] sm:$0xff]  ;;  %v63_v6 = vld [vmem:[#allocation7 + $0x18] sm:$0xff]  ;;  %v64_v10 = vld [vmem:[#allocation7 + $0x20] sm:$0xff]  ;;  %s327_s19 = smov [#allocation8]  }
  0x21   :  { %v232_v7 = vpack.c.bf16 %v63_v6, %v62_v5  ;;  %v65_v11 = vld [vmem:[#allocation7 + $0x28] sm:$0xff]  ;;  %v66_v13 = vld [vmem:[#allocation7 + $0x30] sm:$0xff]  ;;  %v67_v14 = vld [vmem:[#allocation7 + $0x38] sm:$0xff]  ;;  %s160_s20 = sshll.u32 %s327_s19, 4  ;;  %s161_s20 = int_to_ptr.vmem [resolvable:$true] %s160_s20 }
  0x22   :  { %230 = vmatpush3.bf16.xpose.msra.mxu0 %v229_v3  ;;  %v235_v12 = vpack.c.bf16 %v65_v11, %v64_v10  ;;  %v238_v15 = vpack.c.bf16 %v67_v14, %v66_v13  ;;  %v68_v16 = vld [vmem:[#allocation7 + $0x40] sm:$0xff]  ;;  %v69_v17 = vld [vmem:[#allocation7 + $0x48] sm:$0xff]  ;;  %v70_v19 = vld [vmem:[#allocation7 + $0x50] sm:$0xff]  ;;  %s292_s21 = scalar_lea.vmem %s161_s20, 32  ;;  %p297_p12 = scmp.lt.s32.totalorder %s161_s20, %s161_s20 }
  0x23   :  { %231 = vmatprep.subr.bf16.mxu0 %v324_v2  ;;  %v241_v18 = vpack.c.bf16 %v69_v17, %v68_v16  ;;  %v71_v20 = vld [vmem:[#allocation7 + $0x58] sm:$0xff]  ;;  %v72_v22 = vld [vmem:[#allocation7 + $0x60] sm:$0xff]  ;;  %v73_v23 = vld [vmem:[#allocation7 + $0x68] sm:$0xff]  ;;  %p293_p11 = scmp.ne.s32.totalorder %s161_s20, %s292_s21  ;;  %p298_p13 = scmp.lt.s32.totalorder %s292_s21, %s292_s21 }
  0x24   :  { %v244_v21 = vpack.c.bf16 %v71_v20, %v70_v19  ;;  %v247_v24 = vpack.c.bf16 %v73_v23, %v72_v22  ;;  %v74_v25 = vld [vmem:[#allocation7 + $0x70] sm:$0xff]  ;;  %v75_v26 = vld [vmem:[#allocation7 + $0x78] sm:$0xff] }
  0x25   :  { %s44_s1 = scalar_lea.vmem [#allocation7], %s172_s12  ;;  %v250_v27 = vpack.c.bf16 %v75_v26, %v74_v25  ;;  %v174_v29 = vld [vmem:[%s397_s2] ss:$0 sm:$0xff]  ;;  %p299_p0 = por %p298_p13, %p297_p12 }
  0x26   :  { %v45_v8 = vld [vmem:[%s44_s1] sm:$0x1]  ;;  %s48_s14 = scalar_lea.vmem [#allocation7], %s173_s13 }
  0x27   :  { %46 = vst [vmem:[#allocation2] sm:$0x1] %v45_v8  ;;  %v49_v9 = vld [vmem:[%s48_s14] sm:$0x1]  ;;  %p300_p1 = pnand %p299_p0, %p293_p11 }
  0x28   :  { %50 = vst [vmem:[#allocation2 + $0x1] sm:$0x1] %v49_v9  ;;  %v175_v31 = vld [vmem:[%s398_s3] ss:$0 sm:$0xff] }
  0x2a   :  { %233 = vmatpush3.bf16.xpose.msra.mxu0 %v232_v7 }
  0x2b   :  { %234 = vmatprep.subr.bf16.mxu0 %v324_v2 }
  0x2f   :  { %v51_v28 = vld [vmem:[#allocation2] sm:$0x3] }
  0x30   :  { %v59_v30 = vadd.f32 %v174_v29, %v51_v28 }
  0x32   :  { %236 = vmatpush3.bf16.xpose.msra.mxu0 %v235_v12 }
  0x33   :  { %237 = vmatprep.subr.bf16.mxu0 %v324_v2 }
  0x3a   :  { %239 = vmatpush3.bf16.xpose.msra.mxu0 %v238_v15 }
  0x3b   :  { %240 = vmatprep.subr.bf16.mxu0 %v324_v2 }
  0x42   :  { %242 = vmatpush3.bf16.xpose.msra.mxu0 %v241_v18 }
  0x43   :  { %243 = vmatprep.subr.bf16.mxu0 %v324_v2 }
  0x4a   :  { %245 = vmatpush3.bf16.xpose.msra.mxu0 %v244_v21 }
  0x4b   :  { %246 = vmatprep.subr.bf16.mxu0 %v324_v2 }
  0x52   :  { %248 = vmatpush3.bf16.xpose.msra.mxu0 %v247_v24 }
  0x53   :  { %249 = vmatprep.subr.bf16.mxu0 %v324_v2 }
  0x5a   :  { %251 = vmatpush3.bf16.xpose.msra.mxu0 %v250_v27 }
  0x61   :  { %226 = vmatmul.mubr.f32.vlgmr.msra.gmra.mrb[0].mxu0 %v59_v30 }
 0x134   :  { %v149_v32 = vpop.f32.mrb[0].mxu0 }
 0x135   :  { %v150_v33 = vadd.f32 %v175_v31, %v149_v32  ;;  %v227_v34 = vpop.f32.mrb[1].mxu0 }
 0x137   :  { %153 = vst [vmem:[#allocation8] sm:$0x3] %v150_v33 }
 0x138   :  { %303 = shalt.err (!%p300_p1)
}
 0x139   :  { %s304_s23 = scalar_lea.hbm %s399_s4, 32 }
 0x13a   :  { %p305_p2 = scmp.ne.s32.totalorder %s399_s4, %s304_s23  ;;  %p308_p3 = scmp.lt.u32.totalorder %s304_s23, %s399_s4 }
 0x13c   :  { %p310_p4 = pnand %p308_p3, %p305_p2 }
 0x13e   :  { %313 = shalt.err (!%p310_p4)
}
 0x13f   :  { %163 = dma.vmem_to_hbm [thread:$0]  %s161_s20, 32, %s399_s4, [#allocation5]  }
 0x140   :  { %318 = dma.done.wait [#allocation5], 32  }
 0x141   :  { %319 = vsyncadd [#allocation5], 4294967264 }
 0x142   :  { %167 = vsyncpa [#allocation4], 1 }
 0x143   :  { %168 = vsyncpa [#allocation5], 1 }
 0x144   :  { %169 = vsyncpa [#allocation6], 1 }

</bundles_post_ra>
